<compile_context>
chip_gen: v7x
topology: tpu7x:2x2x1
jax: 0.10.0
libtpu: 0.0.40
codegen_flags: <defaults>
</compile_context>

<pallas_src>
import functools

import numpy as np
import jax
import jax.numpy as jnp
from jax import lax
from jax.experimental import pallas as pl
from jax.experimental.pallas import tpu as pltpu


def _round_up(x, m):
    return ((x + m - 1) // m) * m


# ----------------------------------------------------------------------------
# Pallas kernel: per-anchor decode, channel rows on sublanes / anchors on lanes
# ----------------------------------------------------------------------------
def _decode_kernel(head_ref, anchor_ref, score_ref, class_ref, bbox_ref):
    f32 = jnp.float32
    D = head_ref.shape[1]          # 5 + num_classes
    tA = head_ref.shape[2]
    C = D - 5

    # obj / reg rows: read once (5 sublanes), lazily upcast to f32.
    head05 = head_ref[0, 0:5, :].astype(f32)         # (5, tA)
    obj = head05[0:1, :]                              # objectness (1, tA)
    reg_xy = head05[1:3, :]                           # tx, ty     (2, tA)
    reg_wh = head05[3:5, :]                           # tw, th     (2, tA)

    # ---- class max / FIRST argmax (torch.max dim=2 semantics) --------------
    # Sublane-dense: stream 8 class rows per step as (8, tA) vregs; running
    # per-sublane (max, group) with strict > keeps the earliest (smallest)
    # class index per sublane.  Finish with a 7-step cross-sublane reduce
    # using an explicit (value>, or ==value & idx<) tie-break.
    if C >= 8:
        n_full = C // 8
        idx0 = lax.broadcasted_iota(jnp.int32, (8, tA), 0).astype(f32)
        gmax = head_ref[0, 5:13, :].astype(f32)        # group 0 values (8, tA)
        ggrp = jnp.zeros((8, tA), f32)                 # group id per sublane
        for g in range(1, n_full):
            cur = head_ref[0, 5 + 8 * g:13 + 8 * g, :].astype(f32)
            gt = cur > gmax
            gmax = jnp.where(gt, cur, gmax)
            ggrp = jnp.where(gt, f32(g), ggrp)
        gidx = ggrp * f32(8.0) + idx0                  # actual class index
        best_v = gmax[0:1, :]
        best_i = gidx[0:1, :]
        for s in range(1, 8):
            cv = gmax[s:s + 1, :]
            ci = gidx[s:s + 1, :]
            take = (cv > best_v) | ((cv == best_v) & (ci < best_i))
            best_v = jnp.where(take, cv, best_v)
            best_i = jnp.where(take, ci, best_i)
        next_row = 5 + 8 * n_full
    else:
        best_v = head_ref[0, 5:6, :].astype(f32)
        best_i = jnp.zeros_like(best_v)
        next_row = 6

    # leftover class rows (indices larger than everything processed so far,
    # so strict > keeps the earlier / first index on ties)
    for row in range(next_row, D):
        cv = head_ref[0, row:row + 1, :].astype(f32)
        gt = cv > best_v
        best_v = jnp.where(gt, cv, best_v)
        best_i = jnp.where(gt, f32(row - 5), best_i)

    # ---- snap_txtytwth_to_x1y1x2y2 ------------------------------------------
    anc = anchor_ref[0].astype(f32)                    # (5, tA)
    stride = anc[4:5, :]
    ctr = (reg_xy + anc[0:2, :]) * stride              # (2, tA)
    wh = reg_wh * anc[2:4, :] * stride                 # (2, tA)
    half = wh * f32(0.5)
    # torch .int(): truncate toward zero (consumed as float downstream)
    xy_min = (ctr - half).astype(jnp.int32).astype(f32)
    xy_max = (ctr + half).astype(jnp.int32).astype(f32)

    score_ref[0] = best_v * obj
    class_ref[0] = best_i
    bbox_ref[0, 0:2, :] = xy_min
    bbox_ref[0, 2:4, :] = xy_max


def decode_heads_pallas(heads, anchors, *, tile_a=8192):
    """heads: [B, A, 5+C]; anchors: [B, A, 5] or [1, A, 5] (batch-shared).
    Returns (scores [B, A] f32, classes [B, A] f32, bboxes [B, 4, A] f32)."""
    B, A, D = heads.shape
    AB = anchors.shape[0]
    assert AB in (1, B), "anchors batch dim must be 1 (shared) or B"

    # Lane-axis tile: whole A when it fits (block == full dim is always legal),
    # otherwise a 128-aligned tile; B==1 splits A so >=2 parallel steps exist
    # for the two v7x TensorCores.  Partial last blocks are handled by Pallas
    # (OOB reads unspecified but unused; OOB writes clipped) -> no jnp.pad.
    if A > tile_a:
        tile = _round_up(tile_a, 128)
    elif B == 1 and A > 128:
        tile = _round_up(pl.cdiv(A, 2), 128)
    else:
        tile = A
    n_a = pl.cdiv(A, tile)

    # Transpose once so anchors sit on the lane axis (lane-dense vector work).
    heads_t = jnp.transpose(heads, (0, 2, 1))         # [B, D, A]
    anchors_t = jnp.transpose(anchors, (0, 2, 1))     # [AB, 5, A]

    if AB == 1:
        # b is the inner grid axis and the anchor block index ignores b ->
        # the anchor tile is re-used (not re-DMA'd) across consecutive steps.
        anchor_map = lambda a, b: (0, 0, a)
    else:
        anchor_map = lambda a, b: (b, 0, a)

    need = 2 * tile * (D * heads.dtype.itemsize
                       + 5 * anchors.dtype.itemsize + 6 * 4)
    vmem_limit = int(min(56 << 20, max(need + (8 << 20), 16 << 20)))

    scores3, classes3, bboxes = pl.pallas_call(
        _decode_kernel,
        out_shape=(
            jax.ShapeDtypeStruct((B, 1, A), jnp.float32),
            jax.ShapeDtypeStruct((B, 1, A), jnp.float32),
            jax.ShapeDtypeStruct((B, 4, A), jnp.float32),
        ),
        grid_spec=pltpu.PrefetchScalarGridSpec(
            num_scalar_prefetch=0,
            grid=(n_a, B),
            in_specs=[
                pl.BlockSpec((1, D, tile), lambda a, b: (b, 0, a)),
                pl.BlockSpec((1, 5, tile), anchor_map),
            ],
            out_specs=[
                pl.BlockSpec((1, 1, tile), lambda a, b: (b, 0, a)),
                pl.BlockSpec((1, 1, tile), lambda a, b: (b, 0, a)),
                pl.BlockSpec((1, 4, tile), lambda a, b: (b, 0, a)),
            ],
        ),
        compiler_params=pltpu.CompilerParams(
            dimension_semantics=("parallel", "parallel"),
            vmem_limit_bytes=vmem_limit),
    )(heads_t, anchors_t)

    return scores3[:, 0, :], classes3[:, 0, :], bboxes


# ----------------------------------------------------------------------------
# Plain-JAX post-processing (threshold / top-k / greedy NMS / packing)
# TODO(synk): greedy NMS is a data-dependent sequential loop; kept in plain
#             JAX (fixed-size lax.fori_loop) rather than a Pallas kernel.
# ----------------------------------------------------------------------------
def _greedy_nms_keep(boxes, valid, nms_type, nms_threshold):
    T = boxes.shape[0]
    wh = boxes[:, 2:4] - boxes[:, 0:2]
    areas = jnp.maximum(wh[:, 0] * wh[:, 1], 1e-4)
    tl = jnp.maximum(boxes[:, None, 0:2], boxes[None, :, 0:2])
    br = jnp.minimum(boxes[:, None, 2:4], boxes[None, :, 2:4])
    inter_wh = jnp.maximum(br - tl, 0.0)
    inter = inter_wh[..., 0] * inter_wh[..., 1]
    union = jnp.maximum(areas[:, None] + areas[None, :] - inter, 1e-4)
    iou = inter / union

    if nms_type == 'DIoU_python_nms':
        enc_tl = jnp.minimum(boxes[:, None, 0:2], boxes[None, :, 0:2])
        enc_br = jnp.maximum(boxes[:, None, 2:4], boxes[None, :, 2:4])
        enc_wh = jnp.maximum(enc_br - enc_tl, 1e-4)
        c2 = jnp.maximum((enc_wh ** 2).sum(-1), 1e-4)
        ctr = (boxes[:, 0:2] + boxes[:, 2:4]) * 0.5
        p2 = ((ctr[:, None, :] - ctr[None, :, :]) ** 2).sum(-1)
        iou = iou - p2 / c2

    idx = jnp.arange(T)
    # python_nms / DIoU suppress iou >= thr (ref keeps iou < thr); torch_nms uses >
    if nms_type == 'torch_nms':
        over = iou > nms_threshold
    else:
        over = iou >= nms_threshold

    def body(i, keep):
        active = keep[i] & valid[i]
        suppress = active & over[i] & (idx > i)
        return keep & jnp.logical_not(suppress)

    return lax.fori_loop(0, T, body, valid)


def _postprocess_single(scores, classes, bboxes_t, *, topn, min_score_threshold,
                        nms_type, nms_threshold, max_object_num):
    """scores/classes: [A]; bboxes_t: [4, A] (kernel layout, no full transpose)."""
    A = scores.shape[0]
    t = min(topn, A)
    # descending top-k instead of a full argsort (A can be ~22k per image)
    s, order = lax.top_k(scores, t)
    c = classes[order]
    b = jnp.transpose(bboxes_t[:, order])          # gather topn cols, then (t,4)
    valid = s > min_score_threshold
    keep = _greedy_nms_keep(b, valid, nms_type, nms_threshold)

    # compact kept detections to the front, preserving score order (stable sort)
    compact = jnp.argsort(jnp.where(keep, 0, 1))
    keep_sorted = keep[compact]
    s = jnp.where(keep_sorted, s[compact], jnp.float32(-1.0))
    c = jnp.where(keep_sorted, c[compact], jnp.float32(-1.0))
    b = jnp.where(keep_sorted[:, None], b[compact], jnp.float32(0.0))

    if t >= max_object_num:
        return s[:max_object_num], c[:max_object_num], b[:max_object_num]
    pad = max_object_num - t
    return (jnp.concatenate([s, jnp.full((pad,), -1.0, jnp.float32)]),
            jnp.concatenate([c, jnp.full((pad,), -1.0, jnp.float32)]),
            jnp.concatenate([b, jnp.zeros((pad, 4), jnp.float32)]))


class Yolov4Decoder:
    def __init__(self, topn=1000, min_score_threshold=0.05,
                 nms_type='torch_nms', nms_threshold=0.5, max_object_num=100,
                 shared_anchors=True):
        assert nms_type in ['torch_nms', 'python_nms', 'DIoU_python_nms']
        self.topn = topn
        self.min_score_threshold = min_score_threshold
        self.nms_type = nms_type
        self.nms_threshold = nms_threshold
        self.max_object_num = max_object_num
        # YOLOv4 anchors are generated from feature-map geometry only and are
        # identical for every image in the batch; when True they are fetched
        # once instead of being re-DMA'd per image.
        self.shared_anchors = shared_anchors

    def __call__(self, obj_reg_cls_heads, batch_anchors):
        B = obj_reg_cls_heads[0].shape[0]
        D = obj_reg_cls_heads[0].shape[-1]
        heads = jnp.concatenate(
            [h.reshape(B, -1, D) for h in obj_reg_cls_heads], axis=1)
        anchors = jnp.concatenate(
            [a.reshape(a.shape[0], -1, a.shape[-1]) for a in batch_anchors],
            axis=1)
        if self.shared_anchors and anchors.shape[0] > 1:
            anchors = anchors[:1]

        cls_scores, cls_classes, pred_bboxes_t = decode_heads_pallas(heads,
                                                                     anchors)

        post_fn = functools.partial(
            _postprocess_single,
            topn=self.topn,
            min_score_threshold=self.min_score_threshold,
            nms_type=self.nms_type,
            nms_threshold=self.nms_threshold,
            max_object_num=self.max_object_num)
        return jax.vmap(post_fn)(cls_scores, cls_classes, pred_bboxes_t)


# ----------------------------------------------------------------------------
# helpers for building synthetic inputs + pure-JAX reference of the hot path
# ----------------------------------------------------------------------------
def make_anchors(B, H, W, stride, anchor_whs):
    na = anchor_whs.shape[0]
    ys, xs = jnp.meshgrid(jnp.arange(H, dtype=jnp.float32),
                          jnp.arange(W, dtype=jnp.float32), indexing='ij')
    gx = jnp.broadcast_to(xs[:, :, None], (H, W, na))
    gy = jnp.broadcast_to(ys[:, :, None], (H, W, na))
    aw = jnp.broadcast_to(anchor_whs[None, None, :, 0], (H, W, na))
    ah = jnp.broadcast_to(anchor_whs[None, None, :, 1], (H, W, na))
    st = jnp.full((H, W, na), jnp.float32(stride))
    a = jnp.stack([gx, gy, aw, ah, st], axis=-1)     # [H, W, na, 5]
    return jnp.broadcast_to(a[None], (B, H, W, na, 5)).astype(jnp.float32)


def _decode_reference(heads, anchors):
    obj = heads[:, :, 0]
    reg = heads[:, :, 1:5]
    cls = heads[:, :, 5:]
    scores = jnp.max(cls, axis=2) * obj
    classes = jnp.argmax(cls, axis=2).astype(jnp.float32)
    stride = anchors[:, :, 4:5]
    ctr = (reg[:, :, 0:2] + anchors[:, :, 0:2]) * stride
    wh = reg[:, :, 2:4] * anchors[:, :, 2:4] * stride
    bbox = jnp.concatenate([ctr - wh * 0.5, ctr + wh * 0.5], axis=2)
    return scores, classes, bbox.astype(jnp.int32).astype(jnp.float32)


def _make_heads(key, shape_prefix, C):
    raw = jax.random.normal(key, shape_prefix + (5 + C,), jnp.float32)
    obj = jax.nn.sigmoid(raw[..., 0:1])
    txty = jax.nn.sigmoid(raw[..., 1:3])
    twth = 0.5 * raw[..., 3:5]
    clsp = jax.nn.sigmoid(raw[..., 5:])
    return jnp.concatenate([obj, txty, twth, clsp], axis=-1)


if __name__ == "__main__":
    key = jax.random.PRNGKey(0)
    B, C, na = 2, 20, 3
    level_cfgs = [(8, 8, 32.0), (4, 4, 64.0)]
    anchor_whs = [
        jnp.array([[1.25, 1.625], [2.0, 3.75], [4.125, 2.875]], jnp.float32),
        jnp.array([[1.875, 3.8125], [3.875, 2.8125], [3.6875, 7.4375]],
                  jnp.float32),
    ]

    obj_reg_cls_heads, batch_anchors = [], []
    for (H, W, stride), whs in zip(level_cfgs, anchor_whs):
        key, sub = jax.random.split(key)
        obj_reg_cls_heads.append(_make_heads(sub, (B, H, W, na), C))
        batch_anchors.append(make_anchors(B, H, W, stride, whs))

    decoder = Yolov4Decoder(topn=64, min_score_threshold=0.05,
                            nms_type='python_nms', nms_threshold=0.5,
                            max_object_num=16)
    batch_scores, batch_classes, batch_bboxes = decoder(obj_reg_cls_heads,
                                                        batch_anchors)
    jax.block_until_ready((batch_scores, batch_classes, batch_bboxes))

    # ---- sanity: Pallas decode hot path vs pure-JAX reference --------------
    flat_heads = jnp.concatenate(
        [h.reshape(B, -1, 5 + C) for h in obj_reg_cls_heads], axis=1)
    flat_anch = jnp.concatenate(
        [a.reshape(B, -1, 5) for a in batch_anchors], axis=1)
    s_r, c_r, b_r = _decode_reference(flat_heads, flat_anch)

    # shared-anchor fast path (what the decoder uses)
    s_k, c_k, b_k = decode_heads_pallas(flat_heads, flat_anch[:1])
    np.testing.assert_allclose(np.asarray(s_k), np.asarray(s_r),
                               rtol=1e-5, atol=1e-5)
    np.testing.assert_allclose(np.asarray(c_k), np.asarray(c_r), rtol=0, atol=0)
    # bboxes are integer-valued (torch .int()); 1-unit slack at trunc boundary
    np.testing.assert_allclose(np.asarray(jnp.transpose(b_k, (0, 2, 1))),
                               np.asarray(b_r), rtol=0, atol=1.0)

    # per-image anchors path
    s_k2, c_k2, b_k2 = decode_heads_pallas(flat_heads, flat_anch)
    np.testing.assert_allclose(np.asarray(s_k2), np.asarray(s_r),
                               rtol=1e-5, atol=1e-5)
    np.testing.assert_allclose(np.asarray(c_k2), np.asarray(c_r),
                               rtol=0, atol=0)
    np.testing.assert_allclose(np.asarray(jnp.transpose(b_k2, (0, 2, 1))),
                               np.asarray(b_r), rtol=0, atol=1.0)

    # small-C / ragged-A path: C<8 branch, B==1 lane split, partial last block
    key, sub = jax.random.split(key)
    heads_small = _make_heads(sub, (1, 130), 6)
    key, k1 = jax.random.split(key)
    key, k2 = jax.random.split(key)
    anch_small = jnp.concatenate(
        [jax.random.uniform(k1, (1, 130, 2), jnp.float32, 0.0, 16.0),
         jax.random.uniform(k2, (1, 130, 2), jnp.float32, 0.5, 4.0),
         jnp.full((1, 130, 1), 8.0, jnp.float32)], axis=-1)
    s_k3, c_k3, b_k3 = decode_heads_pallas(heads_small, anch_small)
    s_r3, c_r3, b_r3 = _decode_reference(heads_small, anch_small)
    np.testing.assert_allclose(np.asarray(s_k3), np.asarray(s_r3),
                               rtol=1e-5, atol=1e-5)
    np.testing.assert_allclose(np.asarray(c_k3), np.asarray(c_r3),
                               rtol=0, atol=0)
    np.testing.assert_allclose(np.asarray(jnp.transpose(b_k3, (0, 2, 1))),
                               np.asarray(b_r3), rtol=0, atol=1.0)

    assert batch_scores.shape == (B, 16)
    assert batch_classes.shape == (B, 16)
    assert batch_bboxes.shape == (B, 16, 4)
    print("KERNEL_OK")
</pallas_src>

<mosaic_0001>
module attributes {stable_mosaic.version = 11 : i64} {
  func.func @_decode_kernel(%arg0: i32, %arg1: i32, %arg2: memref<1x25x240xf32, #tpu.memory_space<vmem>>, %arg3: memref<1x5x240xf32, #tpu.memory_space<vmem>>, %arg4: memref<1x1x240xf32, #tpu.memory_space<vmem>>, %arg5: memref<1x1x240xf32, #tpu.memory_space<vmem>>, %arg6: memref<1x4x240xf32, #tpu.memory_space<vmem>>) attributes {dimension_semantics = [#tpu.dimension_semantics<parallel>, #tpu.dimension_semantics<parallel>], iteration_bounds = array<i64: 1, 2>, scalar_prefetch = 0 : i64, scratch_operands = 0 : i64, tpu.core_type = #tpu.core_type<tc>, window_params = [{transform_indices = @transform_0, window_bounds = array<i64: 1, 25, 240>}, {transform_indices = @transform_1, window_bounds = array<i64: 1, 5, 240>}, {transform_indices = @transform_2, window_bounds = array<i64: 1, 1, 240>}, {transform_indices = @transform_3, window_bounds = array<i64: 1, 1, 240>}, {transform_indices = @transform_4, window_bounds = array<i64: 1, 4, 240>}]} {
    %c0 = arith.constant 0 : index
    %c0_0 = arith.constant 0 : index
    %c0_1 = arith.constant 0 : index
    %0 = vector.load %arg2[%c0, %c0_0, %c0_1] : memref<1x25x240xf32, #tpu.memory_space<vmem>>, vector<1x5x240xf32>
    %1 = vector.shape_cast %0 : vector<1x5x240xf32> to vector<5x240xf32>
    %2 = vector.extract_strided_slice %1 {offsets = [0, 0], sizes = [1, 240], strides = [1, 1]} : vector<5x240xf32> to vector<1x240xf32>
    %3 = vector.extract_strided_slice %1 {offsets = [1, 0], sizes = [2, 240], strides = [1, 1]} : vector<5x240xf32> to vector<2x240xf32>
    %4 = vector.extract_strided_slice %1 {offsets = [3, 0], sizes = [2, 240], strides = [1, 1]} : vector<5x240xf32> to vector<2x240xf32>
    %5 = tpu.iota {dimensions = array<i32: 0>} : vector<8x240xi32>
    %6 = arith.sitofp %5 : vector<8x240xi32> to vector<8x240xf32>
    %c0_2 = arith.constant 0 : index
    %c5 = arith.constant 5 : index
    %c0_3 = arith.constant 0 : index
    %7 = vector.load %arg2[%c0_2, %c5, %c0_3] : memref<1x25x240xf32, #tpu.memory_space<vmem>>, vector<1x8x240xf32>
    %8 = vector.shape_cast %7 : vector<1x8x240xf32> to vector<8x240xf32>
    %cst = arith.constant 0.000000e+00 : f32
    %9 = vector.broadcast %cst : f32 to vector<8x240xf32>
    %c0_4 = arith.constant 0 : index
    %c13 = arith.constant 13 : index
    %c0_5 = arith.constant 0 : index
    %10 = vector.load %arg2[%c0_4, %c13, %c0_5] : memref<1x25x240xf32, #tpu.memory_space<vmem>>, vector<1x8x240xf32>
    %11 = vector.shape_cast %10 : vector<1x8x240xf32> to vector<8x240xf32>
    %12 = arith.cmpf ogt, %11, %8 : vector<8x240xf32>
    %13 = arith.select %12, %11, %8 : vector<8x240xi1>, vector<8x240xf32>
    %cst_6 = arith.constant 1.000000e+00 : f32
    %14 = vector.broadcast %cst_6 : f32 to vector<8x240xf32>
    %15 = arith.select %12, %14, %9 : vector<8x240xi1>, vector<8x240xf32>
    %cst_7 = arith.constant 8.000000e+00 : f32
    %16 = vector.broadcast %cst_7 : f32 to vector<8x240xf32>
    %17 = arith.mulf %15, %16 : vector<8x240xf32>
    %18 = arith.addf %17, %6 : vector<8x240xf32>
    %19 = vector.extract_strided_slice %13 {offsets = [0, 0], sizes = [1, 240], strides = [1, 1]} : vector<8x240xf32> to vector<1x240xf32>
    %20 = vector.extract_strided_slice %18 {offsets = [0, 0], sizes = [1, 240], strides = [1, 1]} : vector<8x240xf32> to vector<1x240xf32>
    %21 = vector.extract_strided_slice %13 {offsets = [1, 0], sizes = [1, 240], strides = [1, 1]} : vector<8x240xf32> to vector<1x240xf32>
    %22 = vector.extract_strided_slice %18 {offsets = [1, 0], sizes = [1, 240], strides = [1, 1]} : vector<8x240xf32> to vector<1x240xf32>
    %23 = arith.cmpf ogt, %21, %19 : vector<1x240xf32>
    %24 = arith.cmpf oeq, %21, %19 : vector<1x240xf32>
    %25 = arith.cmpf olt, %22, %20 : vector<1x240xf32>
    %26 = arith.andi %24, %25 : vector<1x240xi1>
    %27 = arith.ori %23, %26 : vector<1x240xi1>
    %28 = arith.select %27, %21, %19 : vector<1x240xi1>, vector<1x240xf32>
    %29 = arith.select %27, %22, %20 : vector<1x240xi1>, vector<1x240xf32>
    %30 = vector.extract_strided_slice %13 {offsets = [2, 0], sizes = [1, 240], strides = [1, 1]} : vector<8x240xf32> to vector<1x240xf32>
    %31 = vector.extract_strided_slice %18 {offsets = [2, 0], sizes = [1, 240], strides = [1, 1]} : vector<8x240xf32> to vector<1x240xf32>
    %32 = arith.cmpf ogt, %30, %28 : vector<1x240xf32>
    %33 = arith.cmpf oeq, %30, %28 : vector<1x240xf32>
    %34 = arith.cmpf olt, %31, %29 : vector<1x240xf32>
    %35 = arith.andi %33, %34 : vector<1x240xi1>
    %36 = arith.ori %32, %35 : vector<1x240xi1>
    %37 = arith.select %36, %30, %28 : vector<1x240xi1>, vector<1x240xf32>
    %38 = arith.select %36, %31, %29 : vector<1x240xi1>, vector<1x240xf32>
    %39 = vector.extract_strided_slice %13 {offsets = [3, 0], sizes = [1, 240], strides = [1, 1]} : vector<8x240xf32> to vector<1x240xf32>
    %40 = vector.extract_strided_slice %18 {offsets = [3, 0], sizes = [1, 240], strides = [1, 1]} : vector<8x240xf32> to vector<1x240xf32>
    %41 = arith.cmpf ogt, %39, %37 : vector<1x240xf32>
    %42 = arith.cmpf oeq, %39, %37 : vector<1x240xf32>
    %43 = arith.cmpf olt, %40, %38 : vector<1x240xf32>
    %44 = arith.andi %42, %43 : vector<1x240xi1>
    %45 = arith.ori %41, %44 : vector<1x240xi1>
    %46 = arith.select %45, %39, %37 : vector<1x240xi1>, vector<1x240xf32>
    %47 = arith.select %45, %40, %38 : vector<1x240xi1>, vector<1x240xf32>
    %48 = vector.extract_strided_slice %13 {offsets = [4, 0], sizes = [1, 240], strides = [1, 1]} : vector<8x240xf32> to vector<1x240xf32>
    %49 = vector.extract_strided_slice %18 {offsets = [4, 0], sizes = [1, 240], strides = [1, 1]} : vector<8x240xf32> to vector<1x240xf32>
    %50 = arith.cmpf ogt, %48, %46 : vector<1x240xf32>
    %51 = arith.cmpf oeq, %48, %46 : vector<1x240xf32>
    %52 = arith.cmpf olt, %49, %47 : vector<1x240xf32>
    %53 = arith.andi %51, %52 : vector<1x240xi1>
    %54 = arith.ori %50, %53 : vector<1x240xi1>
    %55 = arith.select %54, %48, %46 : vector<1x240xi1>, vector<1x240xf32>
    %56 = arith.select %54, %49, %47 : vector<1x240xi1>, vector<1x240xf32>
    %57 = vector.extract_strided_slice %13 {offsets = [5, 0], sizes = [1, 240], strides = [1, 1]} : vector<8x240xf32> to vector<1x240xf32>
    %58 = vector.extract_strided_slice %18 {offsets = [5, 0], sizes = [1, 240], strides = [1, 1]} : vector<8x240xf32> to vector<1x240xf32>
    %59 = arith.cmpf ogt, %57, %55 : vector<1x240xf32>
    %60 = arith.cmpf oeq, %57, %55 : vector<1x240xf32>
    %61 = arith.cmpf olt, %58, %56 : vector<1x240xf32>
    %62 = arith.andi %60, %61 : vector<1x240xi1>
    %63 = arith.ori %59, %62 : vector<1x240xi1>
    %64 = arith.select %63, %57, %55 : vector<1x240xi1>, vector<1x240xf32>
    %65 = arith.select %63, %58, %56 : vector<1x240xi1>, vector<1x240xf32>
    %66 = vector.extract_strided_slice %13 {offsets = [6, 0], sizes = [1, 240], strides = [1, 1]} : vector<8x240xf32> to vector<1x240xf32>
    %67 = vector.extract_strided_slice %18 {offsets = [6, 0], sizes = [1, 240], strides = [1, 1]} : vector<8x240xf32> to vector<1x240xf32>
    %68 = arith.cmpf ogt, %66, %64 : vector<1x240xf32>
    %69 = arith.cmpf oeq, %66, %64 : vector<1x240xf32>
    %70 = arith.cmpf olt, %67, %65 : vector<1x240xf32>
    %71 = arith.andi %69, %70 : vector<1x240xi1>
    %72 = arith.ori %68, %71 : vector<1x240xi1>
    %73 = arith.select %72, %66, %64 : vector<1x240xi1>, vector<1x240xf32>
    %74 = arith.select %72, %67, %65 : vector<1x240xi1>, vector<1x240xf32>
    %75 = vector.extract_strided_slice %13 {offsets = [7, 0], sizes = [1, 240], strides = [1, 1]} : vector<8x240xf32> to vector<1x240xf32>
    %76 = vector.extract_strided_slice %18 {offsets = [7, 0], sizes = [1, 240], strides = [1, 1]} : vector<8x240xf32> to vector<1x240xf32>
    %77 = arith.cmpf ogt, %75, %73 : vector<1x240xf32>
    %78 = arith.cmpf oeq, %75, %73 : vector<1x240xf32>
    %79 = arith.cmpf olt, %76, %74 : vector<1x240xf32>
    %80 = arith.andi %78, %79 : vector<1x240xi1>
    %81 = arith.ori %77, %80 : vector<1x240xi1>
    %82 = arith.select %81, %75, %73 : vector<1x240xi1>, vector<1x240xf32>
    %83 = arith.select %81, %76, %74 : vector<1x240xi1>, vector<1x240xf32>
    %c0_8 = arith.constant 0 : index
    %c21 = arith.constant 21 : index
    %c0_9 = arith.constant 0 : index
    %84 = vector.load %arg2[%c0_8, %c21, %c0_9] : memref<1x25x240xf32, #tpu.memory_space<vmem>>, vector<1x1x240xf32>
    %85 = vector.shape_cast %84 : vector<1x1x240xf32> to vector<1x240xf32>
    %86 = arith.cmpf ogt, %85, %82 : vector<1x240xf32>
    %87 = arith.select %86, %85, %82 : vector<1x240xi1>, vector<1x240xf32>
    %cst_10 = arith.constant 1.600000e+01 : f32
    %88 = vector.broadcast %cst_10 : f32 to vector<1x240xf32>
    %89 = arith.select %86, %88, %83 : vector<1x240xi1>, vector<1x240xf32>
    %c0_11 = arith.constant 0 : index
    %c22 = arith.constant 22 : index
    %c0_12 = arith.constant 0 : index
    %90 = vector.load %arg2[%c0_11, %c22, %c0_12] : memref<1x25x240xf32, #tpu.memory_space<vmem>>, vector<1x1x240xf32>
    %91 = vector.shape_cast %90 : vector<1x1x240xf32> to vector<1x240xf32>
    %92 = arith.cmpf ogt, %91, %87 : vector<1x240xf32>
    %93 = arith.select %92, %91, %87 : vector<1x240xi1>, vector<1x240xf32>
    %cst_13 = arith.constant 1.700000e+01 : f32
    %94 = vector.broadcast %cst_13 : f32 to vector<1x240xf32>
    %95 = arith.select %92, %94, %89 : vector<1x240xi1>, vector<1x240xf32>
    %c0_14 = arith.constant 0 : index
    %c23 = arith.constant 23 : index
    %c0_15 = arith.constant 0 : index
    %96 = vector.load %arg2[%c0_14, %c23, %c0_15] : memref<1x25x240xf32, #tpu.memory_space<vmem>>, vector<1x1x240xf32>
    %97 = vector.shape_cast %96 : vector<1x1x240xf32> to vector<1x240xf32>
    %98 = arith.cmpf ogt, %97, %93 : vector<1x240xf32>
    %99 = arith.select %98, %97, %93 : vector<1x240xi1>, vector<1x240xf32>
    %cst_16 = arith.constant 1.800000e+01 : f32
    %100 = vector.broadcast %cst_16 : f32 to vector<1x240xf32>
    %101 = arith.select %98, %100, %95 : vector<1x240xi1>, vector<1x240xf32>
    %c0_17 = arith.constant 0 : index
    %c24 = arith.constant 24 : index
    %c0_18 = arith.constant 0 : index
    %102 = vector.load %arg2[%c0_17, %c24, %c0_18] : memref<1x25x240xf32, #tpu.memory_space<vmem>>, vector<1x1x240xf32>
    %103 = vector.shape_cast %102 : vector<1x1x240xf32> to vector<1x240xf32>
    %104 = arith.cmpf ogt, %103, %99 : vector<1x240xf32>
    %105 = arith.select %104, %103, %99 : vector<1x240xi1>, vector<1x240xf32>
    %cst_19 = arith.constant 1.900000e+01 : f32
    %106 = vector.broadcast %cst_19 : f32 to vector<1x240xf32>
    %107 = arith.select %104, %106, %101 : vector<1x240xi1>, vector<1x240xf32>
    %c0_20 = arith.constant 0 : index
    %c0_21 = arith.constant 0 : index
    %c0_22 = arith.constant 0 : index
    %108 = vector.load %arg3[%c0_20, %c0_21, %c0_22] : memref<1x5x240xf32, #tpu.memory_space<vmem>>, vector<1x5x240xf32>
    %109 = vector.shape_cast %108 : vector<1x5x240xf32> to vector<5x240xf32>
    %110 = vector.extract_strided_slice %109 {offsets = [4, 0], sizes = [1, 240], strides = [1, 1]} : vector<5x240xf32> to vector<1x240xf32>
    %111 = vector.extract_strided_slice %109 {offsets = [0, 0], sizes = [2, 240], strides = [1, 1]} : vector<5x240xf32> to vector<2x240xf32>
    %112 = arith.addf %3, %111 : vector<2x240xf32>
    %113 = vector.broadcast %110 : vector<1x240xf32> to vector<2x240xf32>
    %114 = arith.mulf %112, %113 : vector<2x240xf32>
    %115 = vector.extract_strided_slice %109 {offsets = [2, 0], sizes = [2, 240], strides = [1, 1]} : vector<5x240xf32> to vector<2x240xf32>
    %116 = arith.mulf %4, %115 : vector<2x240xf32>
    %117 = vector.broadcast %110 : vector<1x240xf32> to vector<2x240xf32>
    %118 = arith.mulf %116, %117 : vector<2x240xf32>
    %cst_23 = arith.constant 5.000000e-01 : f32
    %119 = vector.broadcast %cst_23 : f32 to vector<2x240xf32>
    %120 = arith.mulf %118, %119 : vector<2x240xf32>
    %121 = arith.subf %114, %120 : vector<2x240xf32>
    %122 = arith.fptosi %121 : vector<2x240xf32> to vector<2x240xi32>
    %123 = arith.sitofp %122 : vector<2x240xi32> to vector<2x240xf32>
    %124 = arith.addf %114, %120 : vector<2x240xf32>
    %125 = arith.fptosi %124 : vector<2x240xf32> to vector<2x240xi32>
    %126 = arith.sitofp %125 : vector<2x240xi32> to vector<2x240xf32>
    %127 = arith.mulf %105, %2 : vector<1x240xf32>
    %c0_24 = arith.constant 0 : index
    %c0_25 = arith.constant 0 : index
    %c0_26 = arith.constant 0 : index
    %128 = vector.load %arg4[%c0_24, %c0_25, %c0_26] : memref<1x1x240xf32, #tpu.memory_space<vmem>>, vector<1x1x240xf32>
    %129 = vector.shape_cast %128 : vector<1x1x240xf32> to vector<1x240xf32>
    %130 = vector.shape_cast %127 : vector<1x240xf32> to vector<1x1x240xf32>
    tpu.vector_store %arg4[%c0_24, %c0_25, %c0_26], %130 {strides = array<i32>} : memref<1x1x240xf32, #tpu.memory_space<vmem>>, vector<1x1x240xf32>,
    %c0_27 = arith.constant 0 : index
    %c0_28 = arith.constant 0 : index
    %c0_29 = arith.constant 0 : index
    %131 = vector.load %arg5[%c0_27, %c0_28, %c0_29] : memref<1x1x240xf32, #tpu.memory_space<vmem>>, vector<1x1x240xf32>
    %132 = vector.shape_cast %131 : vector<1x1x240xf32> to vector<1x240xf32>
    %133 = vector.shape_cast %107 : vector<1x240xf32> to vector<1x1x240xf32>
    tpu.vector_store %arg5[%c0_27, %c0_28, %c0_29], %133 {strides = array<i32>} : memref<1x1x240xf32, #tpu.memory_space<vmem>>, vector<1x1x240xf32>,
    %c0_30 = arith.constant 0 : index
    %c0_31 = arith.constant 0 : index
    %c0_32 = arith.constant 0 : index
    %134 = vector.load %arg6[%c0_30, %c0_31, %c0_32] : memref<1x4x240xf32, #tpu.memory_space<vmem>>, vector<1x2x240xf32>
    %135 = vector.shape_cast %134 : vector<1x2x240xf32> to vector<2x240xf32>
    %136 = vector.shape_cast %123 : vector<2x240xf32> to vector<1x2x240xf32>
    tpu.vector_store %arg6[%c0_30, %c0_31, %c0_32], %136 {strides = array<i32>} : memref<1x4x240xf32, #tpu.memory_space<vmem>>, vector<1x2x240xf32>,
    %c0_33 = arith.constant 0 : index
    %c2 = arith.constant 2 : index
    %c0_34 = arith.constant 0 : index
    %137 = vector.load %arg6[%c0_33, %c2, %c0_34] : memref<1x4x240xf32, #tpu.memory_space<vmem>>, vector<1x2x240xf32>
    %138 = vector.shape_cast %137 : vector<1x2x240xf32> to vector<2x240xf32>
    %139 = vector.shape_cast %126 : vector<2x240xf32> to vector<1x2x240xf32>
    tpu.vector_store %arg6[%c0_33, %c2, %c0_34], %139 {strides = array<i32>} : memref<1x4x240xf32, #tpu.memory_space<vmem>>, vector<1x2x240xf32>,
    return
  }
  func.func @transform_0(%arg0: i32, %arg1: i32) -> (i32, i32, i32) {
    %c0_i32 = arith.constant 0 : i32
    %c0_i32_0 = arith.constant 0 : i32
    return %arg1, %c0_i32, %arg0 : i32, i32, i32
  }
  func.func @transform_1(%arg0: i32, %arg1: i32) -> (i32, i32, i32) {
    %c0_i32 = arith.constant 0 : i32
    %c0_i32_0 = arith.constant 0 : i32
    %c0_i32_1 = arith.constant 0 : i32
    return %c0_i32, %c0_i32_0, %arg0 : i32, i32, i32
  }
  func.func @transform_2(%arg0: i32, %arg1: i32) -> (i32, i32, i32) {
    %c0_i32 = arith.constant 0 : i32
    %c0_i32_0 = arith.constant 0 : i32
    return %arg1, %c0_i32, %arg0 : i32, i32, i32
  }
  func.func @transform_3(%arg0: i32, %arg1: i32) -> (i32, i32, i32) {
    %c0_i32 = arith.constant 0 : i32
    %c0_i32_0 = arith.constant 0 : i32
    return %arg1, %c0_i32, %arg0 : i32, i32, i32
  }
  func.func @transform_4(%arg0: i32, %arg1: i32) -> (i32, i32, i32) {
    %c0_i32 = arith.constant 0 : i32
    %c0_i32_0 = arith.constant 0 : i32
    return %arg1, %c0_i32, %arg0 : i32, i32, i32
  }
}

</mosaic_0001>

<bundles_post_ra>
// kernel: tpu_custom_call.1
= control target key start
LH: loop header
LB: loop body
LE: loop exit
PB: predicated region body
PF: predicated region fallthrough
CT: control target
= control target key end

     0   :  { %s1520_s0 = inlined_call_operand.vmem [shape: f32[2,25,240], index: 0, kind: input, shape index: {}]   ;;  %s1521_s1 = inlined_call_operand.vmem [shape: f32[1,5,240], index: 1, kind: input, shape index: {}]   ;;  %s1522_s2 = inlined_call_operand.hbm [shape: f32[2,1,240], index: 2, kind: output, shape index: {0}]   ;;  %s1523_s3 = inlined_call_operand.hbm [shape: f32[2,1,240], index: 3, kind: output, shape index: {1}]   ;;  %s1524_s4 = inlined_call_operand.hbm [shape: f32[2,4,240], index: 4, kind: output, shape index: {2}]  }
   0x1   :  { %1527 = sst [smem:[#allocation10_spill]] %s1520_s0 }
   0x2   :  { %1528 = sst [smem:[#allocation11_spill]] %s1521_s1 }
   0x3   :  { %10 = vsyncpa [#allocation3], 0 }
   0x4   :  { %12 = vsyncpa [#allocation3 + $0x1], 0 }
   0x5   :  { %13 = vsyncpa [#allocation5], 0 }
   0x6   :  { %15 = vsyncpa [#allocation5 + $0x1], 0  ;;  %s1129_s15 = smov 0   ;;  %s1131_s16 = smov 0  }
   0x7   :  { %s1133_s17 = smov 0   ;;  %s1135_s18 = smov 0  }
   0x8   :  { %s1137_s19 = smov 0   ;;  %s1139_s20 = smov 0  }
   0x9 LB: > { %s852_s21 = sadd.s32 4294967295, %s1097_s20   ;;  %s1525_s22 = sadd.s32 4294967294, %s1097_s20   ;;  %s1097_s20 = sphi %s1139_s20, %s21_s20   ;;  %s1093_s19 = sphi %s1137_s19, %s1544_s19   ;;  %s1089_s18 = sphi %s1135_s18, %s1543_s18   ;;  %s1085_s17 = sphi %s1133_s17, %s1542_s17   ;;  %s1081_s16 = sphi %s1131_s16, %s1541_s16   ;;  %s1077_s15 = sphi %s1129_s15, %s1540_s15  }
   0xa   : > { %s30_s23 = sadd.s32 1, %s1093_s19  ;;  %s96_s24 = sadd.s32 1, %s1085_s17 }
   0xb   : > { %p31_p0 = scmp.ge.s32.totalorder %s30_s23, 2  ;;  %p106_p1 = scmp.ne.s32.totalorder %s1085_s17, %s1081_s16 }
   0xc   : > { %p107_p2 = scmp.eq.s32.totalorder %s852_s21, 1  ;;  %p112_p3 = scmp.ne.s32.totalorder %s1081_s16, %s1077_s15 }
   0xd   : > { %s1546_s23 = smov (%p31_p0, %s30_s23), 0  ;;  %p113_p5 = scmp.eq.s32.totalorder %s1525_s22, 1 }
   0xe   : > { %1529 = sst [smem:[#allocation9_spill]] %s1546_s23  ;;  %p1171_p4 = por %p107_p2, %p106_p1 }
   0xf   : > { %s91_s26 = ssub.s32 %s1093_s19, %s1546_s23  ;;  %p857_p6 = scmp.ge.s32.totalorder %s1097_s20, 1 }
  0x10   : > { %p94_p7 = scmp.eq.s32.totalorder %s91_s26, 0  ;;  %p1180_p8 = por %p113_p5, %p112_p3 }
  0x11   : > { %p209_p9 = scmp.lt.s32.totalorder %s1097_s20, 3 }
  0x12   : > { %s1186_s28 = scalar_select %p94_p7, %s1085_s17, %s96_s24  }
  0x13   : > { %p210_p10 = pnand %p857_p6, %p209_p9 }
  0x14   : > { %p255_p11 = scmp.lt.s32.totalorder (!%p210_p10), %s1089_s18, 1  ;;  %v275_v0 = vlaneseq (!%p210_p10)  ;;  %s1532_s0 = sld [smem:[#allocation10_spill]] (!%p210_p10)  ;;  %v1099_v15 = vmov (!%p210_p10), 0.0  }
  0x15   : > { %213 = sbr.rel (%p210_p10) target bundleno = 162 (0xa2), region = 28  ;;  %s1533_s1 = sld [smem:[#allocation11_spill]] (!%p210_p10) }
  0x16   : > { %v1190_v1 = vshrl.u32 (!%p210_p10), %v275_v0, 7  ;;  %s1305_s12 = sand.u32 (!%p210_p10), 1, %s1081_s16   ;;  %s1391_s6 = sand.u32 (!%p210_p10), 1, %s852_s21  }
  0x17   : > { %s860_s13 = sshll.u32 (!%p210_p10), %s1305_s12, 3  ;;  %s858_s24 = sshll.u32 (!%p210_p10), %s1305_s12, 1 }
  0x18   : > { %v277_v2 = vcvt.s32.f32 (!%p210_p10), %v1190_v1  ;;  %v559_v18 = vsub.s32 (!%p210_p10), 4, %v1190_v1  ;;  %s1338_s14 = scalar_lea.vmem (!%p210_p10), [#allocation6], %s860_s13  ;;  %s246_s26 = scalar_lea.vmem (!%p210_p10), [#allocation4], %s858_s24 }
  0x19   : > { %s880_s8 = sshll.u32 (!%p210_p10), %s1089_s18, 5  ;;  %s694_s9 = sshll.u32 (!%p210_p10), %s1338_s14, 4  ;;  %s1410_s9 = int_to_ptr.vmem [resolvable:$true] %s694_s9 }
  0x1a   : > { %v1222_v14 = vrot.slane (!%p210_p10), %v277_v2, 3  ;;  %s882_s10 = sshll.u32 (!%p210_p10), %s1089_s18, 7  ;;  %s1408_s11 = scalar_lea.hbm (!%p210_p10), %s1523_s3, %s880_s8 }
  0x1b   : > { %v547_v9 = vld [vmem:[%s1533_s1] sm:$0x1f] (!%p210_p10)  ;;  %v548_v19 = vld [vmem:[%s1533_s1 + $0x8] sm:$0x1f] (!%p210_p10)  ;;  %s1422_s21 = scalar_lea.hbm (!%p210_p10), %s1522_s2, %s880_s8  ;;  %s1101_s1 = smov (!%p210_p10), [#allocation4]  }
  0x1c   : > { %s256_s29 = scalar_select %p255_p11, %s1089_s18, 1  ;;  %v551_v24 = vrot.slane %v547_v9, 7  ;;  %v552_v28 = vrot.slane %v548_v19, 7  ;;  %v560_v31 = vrot.slane %v547_v9, %v559_v18  ;;  %v564_v32 = vrot.slane %v548_v19, %v559_v18 }
  0x1d   : > { %s963_s23 = sshll.u32 %s1101_s1, 4  ;;  %s964_s23 = int_to_ptr.vmem [resolvable:$false] %s963_s23 }
  0x1e   : > { %s879_s30 = sshll.u32 %s256_s29, 6  ;;  %s678_s29 = sshll.u32 %s246_s26, 4  ;;  %s1401_s29 = int_to_ptr.vmem [resolvable:$true] %s678_s29 }
  0x1f   : > { %s1196_s7 = scalar_lea.vmem %s1532_s0, %s879_s30  ;;  %s1385_s30 = scalar_lea.vmem [#allocation2], %s858_s24 }
  0x20   : > { %v278_v3 = vld [vmem:[%s1196_s7] sm:$0xe0]  ;;  %v279_v4 = vld [vmem:[%s1196_s7 + $0x8] sm:$0xe0]  ;;  %v282_v5 = vld [vmem:[%s1196_s7 + $0x10] sm:$0xe0]  ;;  %p966_p1 = scmp.lt.s32.totalorder %s1401_s29, %s964_s23 }
  0x21   : > { %v283_v6 = vld [vmem:[%s1196_s7 + $0x18] sm:$0xe0]  ;;  %v1204_v7 = vld [vmem:[%s1196_s7 + $0x10] sm:$0x1f]  ;;  %v1207_v8 = vld [vmem:[%s1196_s7 + $0x20] sm:$0x1f]  ;;  %vm286_vm0 = vcmp.gt.f32.partialorder %v282_v5, %v278_v3 }
  0x22   : > { %vm287_vm1 = vcmp.gt.f32.partialorder %v283_v6, %v279_v4  ;;  %v1213_v10 = vld [vmem:[%s1196_s7 + $0x18] sm:$0x1f]  ;;  %v1216_v11 = vld [vmem:[%s1196_s7 + $0x28] sm:$0x1f]  ;;  %v1218_v12 = vsel %vm286_vm0, %v282_v5, %v278_v3  ;;  %v294_v16 = vsel %vm286_vm0, 1.0, %v1099_v15  ;;  %vm288_vm2 = vcmp.gt.f32.partialorder %v1207_v8, %v1204_v7  ;;  %s662_s5 = sshll.u32 %s1385_s30, 4  ;;  %s1403_s5 = int_to_ptr.vmem [resolvable:$true] %s662_s5 }
  0x23   : > { %v1220_v13 = vsel %vm287_vm1, %v283_v6, %v279_v4  ;;  %v295_v17 = vsel %vm287_vm1, 1.0, %v1099_v15  ;;  %v298_v20 = vmul.f32 8.0, %v294_v16  ;;  %vm289_vm3 = vcmp.gt.f32.partialorder %v1216_v11, %v1213_v10  ;;  %v1241_v27 = vld [vmem:[%s1196_s7] sm:$0x1f]  ;;  %v1247_v30 = vld [vmem:[%s1196_s7 + $0x8] sm:$0x1f] }
  0x24   : > { %v299_v21 = vmul.f32 8.0, %v295_v17  ;;  %v311_v22 = vrot.slane %v1218_v12, 7  ;;  %v312_v23 = vrot.slane %v1220_v13, 7  ;;  %v296_v29 = vsel %vm288_vm2, 1.0, %v1099_v15  ;;  %s959_s0 = scalar_lea.vmem %s1401_s29, 32 }
  0x25   : > { %v1235_v25 = vadd.f32 %v1222_v14, %v298_v20  ;;  %v297_v33 = vsel %vm289_vm3, 1.0, %v1099_v15  ;;  %v555_v36 = vadd.f32 %v551_v24, %v1241_v27  ;;  %v567_v37 = vmul.f32 %v551_v24, %v1241_v27  ;;  %p960_p12 = scmp.ne.s32.totalorder %s1401_s29, %s959_s0 }
  0x26   : > { %v1238_v26 = vadd.f32 %v1222_v14, %v299_v21  ;;  %vm317_vm4 = vcmp.eq.f32.partialorder %v1218_v12, %v311_v22  ;;  %vm315_vm5 = vcmp.gt.f32.partialorder %v1218_v12, %v311_v22  ;;  %vm318_vm6 = vcmp.eq.f32.partialorder %v1220_v13, %v312_v23 }
  0x27   : > { %v321_v34 = vrot.slane %v1235_v25, 7  ;;  %v556_v38 = vadd.f32 %v552_v28, %v1247_v30  ;;  %v568_v39 = vmul.f32 %v552_v28, %v1247_v30  ;;  %vm316_vm9 = vcmp.gt.f32.partialorder %v1220_v13, %v312_v23  ;;  %p961_p13 = pnand %p960_p12, %p1171_p4 }
  0x28   : > { %v322_v35 = vrot.slane %v1238_v26, 7  ;;  %v569_v40 = vmul.f32 %v567_v37, %v560_v31  ;;  %v300_v42 = vmul.f32 8.0, %v296_v29  ;;  %v301_v43 = vmul.f32 8.0, %v297_v33 }
  0x29   : > { %vm325_vm7 = vcmp.lt.f32.partialorder %v1235_v25, %v321_v34  ;;  %v570_v41 = vmul.f32 %v568_v39, %v564_v32  ;;  %v565_v44 = vmul.f32 %v560_v31, %v555_v36  ;;  %v566_v48 = vmul.f32 %v564_v32, %v556_v38  ;;  %p962_p0 = pneg %p961_p13 }
  0x2a   : > { %vm326_vm8 = vcmp.lt.f32.partialorder %v1238_v26, %v322_v35  ;;  %vm327_vm10 = vmand %vm317_vm4, %vm325_vm7  ;;  %v571_v45 = vmul.f32 0.5, %v569_v40  ;;  %v1281_v59 = vsel %vm288_vm2, %v1207_v8, %v1204_v7  ;;  %v1288_v60 = vsel %vm289_vm3, %v1216_v11, %v1213_v10 }
  0x2b   : > { %vm328_vm11 = vmand %vm318_vm6, %vm326_vm8  ;;  %v572_v49 = vmul.f32 0.5, %v570_v41  ;;  %v1291_v63 = vadd.f32 %v1222_v14, %v300_v42  ;;  %v1294_v2 = vadd.f32 %v1222_v14, %v301_v43 }
  0x2c   : > { %vm329_vm12 = vmor %vm315_vm5, %vm327_vm10  ;;  %v575_v56 = vrot.slane %v571_v45, 2 }
  0x2d   : > { %vm330_vm13 = vmor %vm316_vm9, %vm328_vm11  ;;  %v331_v46 = vsel %vm329_vm12, %v1218_v12, %v311_v22  ;;  %v333_v47 = vsel %vm329_vm12, %v1235_v25, %v321_v34  ;;  %v576_v57 = vrot.slane %v572_v49, 2 }
  0x2e   : > { %v332_v50 = vsel %vm330_vm13, %v1220_v13, %v312_v23  ;;  %v334_v51 = vsel %vm330_vm13, %v1238_v26, %v322_v35  ;;  %v337_v52 = vrot.slane %v331_v46, 7  ;;  %v347_v53 = vrot.slane %v333_v47, 7 }
  0x2f   : > { %v338_v54 = vrot.slane %v332_v50, 7  ;;  %v348_v55 = vrot.slane %v334_v51, 7  ;;  %v579_v58 = vsub.f32 %v565_v44, %v575_v56  ;;  %v580_v61 = vsub.f32 %v566_v48, %v576_v57 }
  0x30   : > { %vm341_vm14 = vcmp.gt.f32.partialorder %v1218_v12, %v337_v52  ;;  %vm343_vm15 = vcmp.eq.f32.partialorder %v1218_v12, %v337_v52  ;;  %vm351_vm0 = vcmp.lt.f32.partialorder %v1235_v25, %v347_v53  ;;  %v585_v62 = vadd.f32 %v575_v56, %v565_v44 }
  0x31   : > { %vm342_vm1 = vcmp.gt.f32.partialorder %v1220_v13, %v338_v54  ;;  %vm344_vm4 = vcmp.eq.f32.partialorder %v1220_v13, %v338_v54  ;;  %vm352_vm5 = vcmp.lt.f32.partialorder %v1238_v26, %v348_v55  ;;  %vm353_vm6 = vmand %vm343_vm15, %vm351_vm0  ;;  %v883_v3 = vtrunc.f32 %v579_v58 }
  0x32   : > { %vm354_vm7 = vmand %vm344_vm4, %vm352_vm5  ;;  %v586_v4 = vadd.f32 %v576_v57, %v566_v48  ;;  %v885_v7 = vtrunc.f32 %v580_v61  ;;  %v887_v8 = vtrunc.f32 %v585_v62  ;;  %vm622_vm0 = vcmask 1041408  }
  0x33   : > { %vm355_vm2 = vmor %vm341_vm14, %vm353_vm6  ;;  %v884_v17 = vcvt.f32.s32 %v883_v3  ;;  %vm631_vm5 = vcmask 1043458   ;;  %vm632_vm6 = vcmask 916486  }
  0x34   : > { %vm356_vm8 = vmor %vm342_vm1, %vm354_vm7  ;;  %v357_v5 = vsel %vm355_vm2, %v1218_v12, %v337_v52  ;;  %v359_v6 = vsel %vm355_vm2, %v1235_v25, %v347_v53  ;;  %v886_v18 = vcvt.f32.s32 %v885_v7  ;;  %v888_v12 = vcvt.f32.s32 %v887_v8 }
  0x35   : > { %v358_v9 = vsel %vm356_vm8, %v1220_v13, %v338_v54  ;;  %v360_v10 = vsel %vm356_vm8, %v1238_v26, %v348_v55  ;;  %v363_v11 = vrot.slane %v357_v5, 7  ;;  %v373_v14 = vrot.slane %v359_v6, 7 }
  0x36   : > { %v364_v15 = vrot.slane %v358_v9, 7  ;;  %v374_v16 = vrot.slane %v360_v10, 7  ;;  %v583_v13 = vcvt.s32.f32 %v884_v17  ;;  %v584_v19 = vcvt.s32.f32 %v886_v18 }
  0x37   : > { %vm367_vm3 = vcmp.gt.f32.partialorder %v1281_v59, %v363_v11  ;;  %vm369_vm9 = vcmp.eq.f32.partialorder %v1281_v59, %v363_v11  ;;  %vm377_vm10 = vcmp.lt.f32.partialorder %v1291_v63, %v373_v14  ;;  %vm623_vm1 = vcmask 914436  }
  0x38   : > { %vm368_vm11 = vcmp.gt.f32.partialorder %v1288_v60, %v364_v15  ;;  %vm370_vm12 = vcmp.eq.f32.partialorder %v1288_v60, %v364_v15  ;;  %vm378_vm13 = vcmp.lt.f32.partialorder %v1294_v2, %v374_v16  ;;  %vm379_vm14 = vmand %vm369_vm9, %vm377_vm10  ;;  %v889_v20 = vtrunc.f32 %v586_v4 }
  0x39   : > { %vm380_vm15 = vmand %vm370_vm12, %vm378_vm13  ;;  %v589_v21 = vcvt.s32.f32 %v888_v12  ;;  %v618_v24 = vcombine.low %v583_v13, %v584_v19  ;;  %v1100_v55 = vmov 1966171168   ;;  %v593_v12 = vcombine.low %v1241_v27, %v1247_v30  ;;  %v863_v13 = vld [vmem:[%s1196_s7 + $0x25] ss:$8 sm:$0x3] }
  0x3a   : > { %vm381_vm4 = vmor %vm367_vm3, %vm379_vm14  ;;  %v890_v25 = vcvt.f32.s32 %v889_v20  ;;  %v497_v56 = vunpack.c.l.s4 %v1100_v55  ;;  %v865_v20 = vld [vmem:[%s1196_s7 + $0x27] ss:$8 sm:$0x3] }
  0x3b   : > { %vm382_vm7 = vmor %vm368_vm11, %vm380_vm15  ;;  %v383_v22 = vsel %vm381_vm4, %v1281_v59, %v363_v11  ;;  %v385_v23 = vsel %vm381_vm4, %v1291_v63, %v373_v14  ;;  %v867_v34 = vrot.slane %v618_v24, 9 }
  0x3c   : > { %v384_v26 = vsel %vm382_vm7, %v1288_v60, %v364_v15  ;;  %v386_v28 = vsel %vm382_vm7, %v1294_v2, %v374_v16  ;;  %v389_v29 = vrot.slane %v383_v22, 7  ;;  %v399_v31 = vrot.slane %v385_v23, 7  ;;  %vm624_vm2 = vmor %vm623_vm1, %vm622_vm0 }
  0x3d   : > { %v390_v32 = vrot.slane %v384_v26, 7  ;;  %v400_v33 = vrot.slane %v386_v28, 7  ;;  %v590_v35 = vcvt.s32.f32 %v890_v25  ;;  %vm1329_vm10 = vmor %vm632_vm6, %vm631_vm5  ;;  %625 = vst.msk [vmem:[%s1338_s14] sm:$0x33] %vm624_vm2, %v867_v34  ;;  %v498_v7 = vunpack.c.0.s8 %v497_v56 }
  0x3e   : > { %vm393_vm8 = vcmp.gt.f32.partialorder %v1281_v59, %v389_v29  ;;  %vm395_vm3 = vcmp.eq.f32.partialorder %v1281_v59, %v389_v29  ;;  %vm403_vm9 = vcmp.lt.f32.partialorder %v1291_v63, %v399_v31 }
  0x3f   : > { %vm394_vm11 = vcmp.gt.f32.partialorder %v1288_v60, %v390_v32  ;;  %vm396_vm12 = vcmp.eq.f32.partialorder %v1288_v60, %v390_v32  ;;  %vm404_vm13 = vcmp.lt.f32.partialorder %v1294_v2, %v400_v33  ;;  %vm405_vm14 = vmand %vm395_vm3, %vm403_vm9  ;;  %v628_v37 = vcombine.low %v589_v21, %v590_v35  ;;  %v866_v21 = vld [vmem:[%s1196_s7 + $0x30] ss:$8 sm:$0x3] }
  0x40   : > { %vm406_vm15 = vmand %vm396_vm12, %vm404_vm13  ;;  %v501_v10 = vsub.s32 %v498_v7, %v1190_v1  ;;  %v864_v1 = vld [vmem:[%s1196_s7 + $0x26] ss:$8 sm:$0x3]  ;;  %s641_s7 = scalar_lea.sflag [#allocation5], %s1391_s6 }
  0x41   : > { %vm407_vm0 = vmor %vm393_vm8, %vm405_vm14  ;;  %v629_v38 = vrot.slane %v628_v37, 7 }
  0x42   : > { %vm408_vm1 = vmor %vm394_vm11, %vm406_vm15  ;;  %v409_v39 = vsel %vm407_vm0, %v1281_v59, %v389_v29  ;;  %v411_v40 = vsel %vm407_vm0, %v1291_v63, %v399_v31 }
  0x43   : > { %v410_v41 = vsel %vm408_vm1, %v1288_v60, %v390_v32  ;;  %v412_v42 = vsel %vm408_vm1, %v1294_v2, %v400_v33  ;;  %v415_v43 = vrot.slane %v409_v39, 7  ;;  %v425_v44 = vrot.slane %v411_v40, 7  ;;  %634 = vst.msk [vmem:[%s1338_s14] sm:$0xcc] %vm1329_vm10, %v629_v38  ;;  %s1415_s14 = scalar_lea.hbm %s1524_s4, %s882_s10  ;;  %s965_s10 = scalar_lea.vmem %s964_s23, 64 }
  0x44   : > { %v416_v45 = vrot.slane %v410_v41, 7  ;;  %v426_v46 = vrot.slane %v412_v42, 7  ;;  %p967_p2 = scmp.lt.s32.totalorder %s965_s10, %s959_s0 }
  0x45   : > { %vm419_vm4 = vcmp.gt.f32.partialorder %v1281_v59, %v415_v43  ;;  %vm421_vm5 = vcmp.eq.f32.partialorder %v1281_v59, %v415_v43  ;;  %vm429_vm6 = vcmp.lt.f32.partialorder %v1291_v63, %v425_v44 }
  0x46   : > { %vm420_vm7 = vcmp.gt.f32.partialorder %v1288_v60, %v416_v45  ;;  %vm422_vm2 = vcmp.eq.f32.partialorder %v1288_v60, %v416_v45  ;;  %vm430_vm8 = vcmp.lt.f32.partialorder %v1294_v2, %v426_v46  ;;  %vm431_vm3 = vmand %vm421_vm5, %vm429_vm6  ;;  %p968_p3 = por %p967_p2, %p966_p1 }
  0x47   : > { %vm432_vm9 = vmand %vm422_vm2, %vm430_vm8 }
  0x48   : > { %vm433_vm11 = vmor %vm419_vm4, %vm431_vm3  ;;  %p969_p5 = pnand %p968_p3, %p962_p0 }
  0x49   : > { %vm434_vm12 = vmor %vm420_vm7, %vm432_vm9  ;;  %v435_v47 = vsel %vm433_vm11, %v1281_v59, %v415_v43  ;;  %v437_v48 = vsel %vm433_vm11, %v1291_v63, %v425_v44 }
  0x4a   : > { %v436_v49 = vsel %vm434_vm12, %v1288_v60, %v416_v45  ;;  %v438_v50 = vsel %vm434_vm12, %v1294_v2, %v426_v46  ;;  %v441_v51 = vrot.slane %v435_v47, 7  ;;  %v451_v52 = vrot.slane %v437_v48, 7 }
  0x4b   : > { %v442_v53 = vrot.slane %v436_v49, 7  ;;  %v452_v54 = vrot.slane %v438_v50, 7 }
  0x4c   : > { %vm445_vm10 = vcmp.gt.f32.partialorder %v1281_v59, %v441_v51  ;;  %vm447_vm13 = vcmp.eq.f32.partialorder %v1281_v59, %v441_v51  ;;  %vm455_vm14 = vcmp.lt.f32.partialorder %v1291_v63, %v451_v52 }
  0x4d   : > { %vm446_vm15 = vcmp.gt.f32.partialorder %v1288_v60, %v442_v53  ;;  %vm448_vm0 = vcmp.eq.f32.partialorder %v1288_v60, %v442_v53  ;;  %vm456_vm1 = vcmp.lt.f32.partialorder %v1294_v2, %v452_v54  ;;  %vm457_vm4 = vmand %vm447_vm13, %vm455_vm14 }
  0x4e   : > { %vm458_vm5 = vmand %vm448_vm0, %vm456_vm1 }
  0x4f   : > { %vm459_vm6 = vmor %vm445_vm10, %vm457_vm4 }
  0x50   : > { %vm460_vm7 = vmor %vm446_vm15, %vm458_vm5  ;;  %v461_v57 = vsel %vm459_vm6, %v1281_v59, %v441_v51  ;;  %v463_v58 = vsel %vm459_vm6, %v1291_v63, %v451_v52  ;;  %vm1397_vm5 = vcmp.lt.s32.totalorder %v275_v0, 240 }
  0x51   : > { %v462_v61 = vsel %vm460_vm7, %v1288_v60, %v442_v53  ;;  %v464_v62 = vsel %vm460_vm7, %v1294_v2, %v452_v54  ;;  %v467_v3 = vrot.slane %v461_v57, 7  ;;  %v477_v4 = vrot.slane %v463_v58, 7 }
  0x52   : > { %v468_v5 = vrot.slane %v462_v61, 7  ;;  %v478_v6 = vrot.slane %v464_v62, 7 }
  0x53   : > { %vm471_vm2 = vcmp.gt.f32.partialorder %v1281_v59, %v467_v3  ;;  %vm473_vm8 = vcmp.eq.f32.partialorder %v1281_v59, %v467_v3  ;;  %vm481_vm3 = vcmp.lt.f32.partialorder %v1291_v63, %v477_v4 }
  0x54   : > { %vm472_vm9 = vcmp.gt.f32.partialorder %v1288_v60, %v468_v5  ;;  %vm474_vm11 = vcmp.eq.f32.partialorder %v1288_v60, %v468_v5  ;;  %vm482_vm12 = vcmp.lt.f32.partialorder %v1294_v2, %v478_v6  ;;  %vm483_vm10 = vmand %vm473_vm8, %vm481_vm3 }
  0x55   : > { %vm484_vm13 = vmand %vm474_vm11, %vm482_vm12 }
  0x56   : > { %vm485_vm14 = vmor %vm471_vm2, %vm483_vm10 }
  0x57   : > { %vm486_vm15 = vmor %vm472_vm9, %vm484_vm13  ;;  %v487_v8 = vsel %vm485_vm14, %v1281_v59, %v467_v3  ;;  %v489_v9 = vsel %vm485_vm14, %v1291_v63, %v477_v4 }
  0x58   : > { %v488_v11 = vsel %vm486_vm15, %v1288_v60, %v468_v5  ;;  %v490_v14 = vsel %vm486_vm15, %v1294_v2, %v478_v6  ;;  %v600_v60 = vrot.slane %v593_v12, %v501_v10 }
  0x59   : > { %v495_v15 = vcombine.high %v487_v8, %v488_v11  ;;  %v515_v16 = vcombine.high %v489_v9, %v490_v14 }
  0x5a   : > { %v607_v22 = vrot.slane %v600_v60, %v501_v10 }
  0x5b   : > { %v502_v17 = vrot.slane %v495_v15, %v501_v10  ;;  %v522_v18 = vrot.slane %v515_v16, %v501_v10 }
  0x5d   : > { %v509_v59 = vrot.slane %v502_v17, %v501_v10  ;;  %v529_v63 = vrot.slane %v522_v18, %v501_v10 }
  0x5f   : > { %vm511_vm0 = vcmp.gt.f32.partialorder %v863_v13, %v509_v59 }
  0x60   : > { %v512_v19 = vsel %vm511_vm0, %v863_v13, %v509_v59  ;;  %v531_v2 = vsel %vm511_vm0, 16.0, %v529_v63 }
  0x61   : > { %vm534_vm1 = vcmp.gt.f32.partialorder %v864_v1, %v512_v19 }
  0x62   : > { %v535_v27 = vsel %vm534_vm1, %v864_v1, %v512_v19  ;;  %v536_v30 = vsel %vm534_vm1, 17.0, %v531_v2 }
  0x63   : > { %vm539_vm4 = vcmp.gt.f32.partialorder %v865_v20, %v535_v27 }
  0x64   : > { %v540_v23 = vsel %vm539_vm4, %v865_v20, %v535_v27  ;;  %v541_v24 = vsel %vm539_vm4, 18.0, %v536_v30 }
  0x65   : > { %vm544_vm6 = vcmp.gt.f32.partialorder %v866_v21, %v540_v23 }
  0x66   : > { %v546_v26 = vsel %vm544_vm6, 19.0, %v541_v24  ;;  %v545_v28 = vsel %vm544_vm6, %v866_v21, %v540_v23 }
  0x67   : > { %615 = vst.msk [vmem:[%s246_s26] sm:$0x3] %vm1397_vm5, %v546_v26  ;;  %v609_v0 = vmul.f32 %v607_v22, %v545_v28 }
  0x68   : > { %972 = shalt.err (!%p969_p5)
}
  0x69   : > { %s973_s22 = scalar_lea.hbm %s1408_s11, 32  ;;  %s977_s1 = scalar_lea.hbm %s1523_s3, 64 }
  0x6a   : > { %p974_p6 = scmp.ne.s32.totalorder %s1408_s11, %s973_s22  ;;  %p978_p10 = scmp.lt.u32.totalorder %s1408_s11, %s1523_s3 }
  0x6b   : > { %p979_p11 = scmp.lt.u32.totalorder %s977_s1, %s973_s22  ;;  %p981_p13 = scmp.lt.u32.totalorder %s973_s22, %s1408_s11 }
  0x6c   : > { %p975_p7 = pnand %p974_p6, %p1171_p4 }
  0x6d   : > { %p980_p12 = por %p979_p11, %p978_p10 }
  0x6e   : > { %p976_p9 = pneg %p975_p7 }
  0x6f   : > { %p982_p0 = por %p981_p13, %p980_p12 }
  0x71   : > { %p983_p1 = pnand %p982_p0, %p976_p9 }
  0x73   : > { %986 = shalt.err (!%p983_p1)
}
  0x74   : > { %892 = dma.vmem_to_hbm [thread:$0]  (%p1171_p4), %s1401_s29, 32, %s1408_s11, %s641_s7   ;;  %614 = vst.msk [vmem:[%s1385_s30] sm:$0x3] %vm1397_vm5, %v609_v0 }
  0x75   : > { %s987_s0 = scalar_lea.vmem %s1410_s9, 128  ;;  %s1102_s13 = smov [#allocation6]  }
  0x76   : > { %p988_p2 = scmp.ne.s32.totalorder %s1410_s9, %s987_s0  ;;  %s991_s24 = sshll.u32 %s1102_s13, 4  ;;  %s992_s24 = int_to_ptr.vmem [resolvable:$false] %s991_s24 }
  0x77   : > { %s993_s10 = scalar_lea.vmem %s992_s24, 256  ;;  %p994_p6 = scmp.lt.s32.totalorder %s1410_s9, %s992_s24 }
  0x78   : > { %p989_p3 = pnand %p988_p2, %p1171_p4  ;;  %p995_p7 = scmp.lt.s32.totalorder %s993_s10, %s987_s0 }
  0x7a   : > { %p990_p5 = pneg %p989_p3  ;;  %p996_p9 = por %p995_p7, %p994_p6 }
  0x7c   : > { %p997_p10 = pnand %p996_p9, %p990_p5 }
  0x7e   : > { %1000 = shalt.err (!%p997_p10)
}
  0x7f   : > { %s1001_s29 = scalar_lea.hbm %s1415_s14, 128  ;;  %s1005_s22 = scalar_lea.hbm %s1524_s4, 256 }
  0x80   : > { %p1002_p11 = scmp.ne.s32.totalorder %s1415_s14, %s1001_s29  ;;  %p1006_p0 = scmp.lt.u32.totalorder %s1415_s14, %s1524_s4 }
  0x81   : > { %p1007_p1 = scmp.lt.u32.totalorder %s1005_s22, %s1001_s29  ;;  %p1009_p3 = scmp.lt.u32.totalorder %s1001_s29, %s1415_s14 }
  0x82   : > { %p1003_p12 = pnand %p1002_p11, %p1171_p4 }
  0x83   : > { %p1008_p2 = por %p1007_p1, %p1006_p0 }
  0x84   : > { %p1004_p13 = pneg %p1003_p12 }
  0x85   : > { %p1010_p5 = por %p1009_p3, %p1008_p2 }
  0x87   : > { %p1011_p6 = pnand %p1010_p5, %p1004_p13 }
  0x89   : > { %1014 = shalt.err (!%p1011_p6)
}
  0x8a   : > { %893 = dma.vmem_to_hbm [thread:$0]  (%p1171_p4), %s1410_s9, 128, %s1415_s14, %s641_s7  }
  0x8b   : > { %s636_s1 = scalar_lea.sflag [#allocation3], %s1305_s12  ;;  %s1015_s18 = scalar_lea.vmem %s1403_s5, 32 }
  0x8c   : > { %p1016_p7 = scmp.ne.s32.totalorder %s1403_s5, %s1015_s18  ;;  %s1103_s23 = smov [#allocation2]  }
  0x8d   : > { %s1019_s0 = sshll.u32 %s1103_s23, 4  ;;  %s1020_s0 = int_to_ptr.vmem [resolvable:$false] %s1019_s0 }
  0x8e   : > { %p1017_p9 = pnand %p1016_p7, %p1171_p4  ;;  %s1021_s13 = scalar_lea.vmem %s1020_s0, 64 }
  0x8f   : > { %p1022_p11 = scmp.lt.s32.totalorder %s1403_s5, %s1020_s0  ;;  %p1023_p12 = scmp.lt.s32.totalorder %s1021_s13, %s1015_s18 }
  0x90   : > { %p1018_p10 = pneg %p1017_p9 }
  0x91   : > { %p1024_p13 = por %p1023_p12, %p1022_p11 }
  0x93   : > { %p1025_p0 = pnand %p1024_p13, %p1018_p10 }
  0x95   : > { %1028 = shalt.err (!%p1025_p0)
}
  0x96   : > { %s1029_s12 = scalar_lea.hbm %s1422_s21, 32  ;;  %s1033_s14 = scalar_lea.hbm %s1522_s2, 64 }
  0x97   : > { %p1030_p1 = scmp.ne.s32.totalorder %s1422_s21, %s1029_s12  ;;  %p1034_p5 = scmp.lt.u32.totalorder %s1422_s21, %s1522_s2 }
  0x98   : > { %p1035_p6 = scmp.lt.u32.totalorder %s1033_s14, %s1029_s12  ;;  %p1037_p9 = scmp.lt.u32.totalorder %s1029_s12, %s1422_s21 }
  0x99   : > { %p1031_p2 = pnand %p1030_p1, %p1171_p4 }
  0x9a   : > { %p1036_p7 = por %p1035_p6, %p1034_p5 }
  0x9b   : > { %p1032_p3 = pneg %p1031_p2 }
  0x9c   : > { %p1038_p10 = por %p1037_p9, %p1036_p7 }
  0x9e   : > { %p1039_p11 = pnand %p1038_p10, %p1032_p3 }
  0xa0   : > { %1042 = shalt.err (!%p1039_p11)
}
  0xa1   : > { %891 = dma.vmem_to_hbm [thread:$0]  (%p1171_p4), %s1403_s5, 32, %s1422_s21, %s636_s1  }
  0xa2 PF: > { %p907_p12 = scmp.ge.s32.totalorder %s1097_s20, 2  ;;  %s706_s10 = sand.u32 1, %s1077_s15  }
  0xa3   : > { %s707_s29 = scalar_lea.sflag [#allocation3], %s706_s10 }
  0xa4   : > { %p898_p13 = pnand %p907_p12, %p1180_p8 }
  0xa6   : > { %1068 = dma.done.wait (!%p898_p13), %s707_s29, 32  }
  0xa7   : > { %1070 = vsyncadd (!%p898_p13), %s707_s29, 4294967264  ;;  %s1538_s30 = sadd.s32 4294967294, %s1097_s20  }
  0xa8   : > { %s715_s11 = sand.u32 1, %s1538_s30  }
  0xa9   : > { %s716_s22 = scalar_lea.sflag [#allocation5], %s715_s11 }
  0xaa   : > { %1072 = dma.done.wait (!%p898_p13), %s716_s22, 160  }
  0xab   : > { %1074 = vsyncadd (!%p898_p13), %s716_s22, 4294967136  ;;  %s21_s20 = sadd.s32 1, %s1097_s20   ;;  %s1539_s25 = sld [smem:[#allocation9_spill]] }
  0xac   : > { %p18_p4 = scmp.ge.s32.totalorder %s21_s20, 4   ;;  %s1540_s15 = smov %s1081_s16 }
  0xad   : > { %s1541_s16 = smov %s1085_s17  ;;  %s1542_s17 = smov %s1186_s28 }
  0xae   : > { %s1543_s18 = smov %s1093_s19  ;;  %20 = sbr.rel (!%p18_p4) target bundleno = 9 (0x9), region = 102 }
  0xb1   : > { %s1544_s19 = smov %s1539_s25 }
  0xb5   :  { %730 = vsyncpa [#allocation3], 1 }
  0xb6   :  { %732 = vsyncpa [#allocation3 + $0x1], 1 }
  0xb7   :  { %733 = vsyncpa [#allocation5], 1 }
  0xb8   :  { %735 = vsyncpa [#allocation5 + $0x1], 1 }

</bundles_post_ra>
